<compile_context>
chip_gen: v7x
topology: tpu7x:2x2x1
jax: 0.10.0
libtpu: 0.0.40
codegen_flags: <defaults>
</compile_context>

<pallas_src>
import functools

import jax
import jax.numpy as jnp
from jax.experimental import pallas as pl
from jax.experimental.pallas import tpu as pltpu


def _round_up(x, m):
    return ((x + m - 1) // m) * m


def _edge_encoder_kernel(flag_ref, a_ref, x_ref, o_ref, acc_ref, *, deg_col):
    # flag_ref: SMEM (n_relations + 1,) int32  column split points (scalar prefetch)
    # a_ref:    VMEM (tm, tk)   int8 0/1 adjacency tile of relation r (dst rows x src cols)
    # x_ref:    VMEM (tk, d_p)  bf16 full-width embedding K-slice; column deg_col is 1.0
    # o_ref:    VMEM (tm, d_p)  f32 fused lane-dense output tile (resident across k, r)
    # acc_ref:  VMEM (R, tm, d_p) f32 per-relation running A_r @ X (slab indexed by r)
    k = pl.program_id(1)
    r = pl.program_id(2)
    nk = pl.num_programs(1)

    # bf16 x bf16 MXU matmul with f32 accumulation.  The all-ones column of X makes
    # column `deg_col` of the product the exact f32 in-degree count (no XLU reduce).
    a = a_ref[...].astype(jnp.bfloat16)
    partial = jnp.dot(a, x_ref[...], preferred_element_type=jnp.float32)

    @pl.when(k == 0)
    def _init():
        acc_ref[r] = partial              # first K step: plain write (no zero + RMW)

    @pl.when(k > 0)
    def _accumulate():
        acc_ref[r] = acc_ref[r] + partial

    @pl.when(k == nk - 1)
    def _epilogue():
        acc = acc_ref[r]
        deg = acc[:, deg_col:deg_col + 1]                  # exact f32 integer counts
        # DGL mean: isolated nodes (deg == 0) produce 0.  Reciprocal on the (tm, 1)
        # column + broadcast multiply (instead of dividing the full (tm, d_p) tile).
        inv = jnp.where(deg > 0.0, 1.0 / jnp.maximum(deg, 1.0), 0.0)
        lo = flag_ref[r]
        hi = flag_ref[r + 1]
        col = jax.lax.broadcasted_iota(jnp.int32, acc.shape, 1)
        contrib = jnp.where((col >= lo) & (col < hi), acc * inv, 0.0)

        @pl.when(r == 0)
        def _first_relation():
            o_ref[...] = contrib           # full write initializes the resident block

        @pl.when(r > 0)
        def _other_relations():
            o_ref[...] += contrib


class EdgeEncoder:
    """JAX/Pallas equivalent of KGIN Edge_Encoder.forward.

    The dense 0/1 adjacencies (one per relation) are cast to int8 and padded ONCE at
    construction and reused across forward calls (the adjacency is static), so the
    per-call cost is just the kernel itself plus a small embedding pad/cast.
    """

    def __init__(self, adjs, dim_flag1, *, tm=512, tk=512):
        adjs = jnp.asarray(adjs)
        n_relations, n_dst, n_src = adjs.shape
        assert len(dim_flag1) == n_relations + 1
        assert int(dim_flag1[0]) == 0
        d = int(dim_flag1[-1])

        # Reserve at least one zero-padded lane column and set it to 1.0 in X so the MXU
        # computes the in-degree for free; output stays lane-dense (>= 128-wide stores).
        d_p = _round_up(d + 1, 128)
        deg_col = d

        # int8 min sublane tile is 32 -> dst tile must be a multiple of 32; lane tile 128.
        tm = _round_up(min(tm, _round_up(n_dst, 32)), 32)
        if tm >= 64 and _round_up(n_dst, tm) == tm:
            # Keep >= 2 dst tiles when possible so the 'parallel' dst axis can shard
            # across v7x's two TensorCores (no effect on v5e/v6e, 1 TC per chip).
            tm = _round_up(-(-n_dst // 2), 32)
        tk = _round_up(min(tk, _round_up(n_src, 128)), 128)

        n_dst_p = _round_up(n_dst, tm)
        n_src_p = _round_up(n_src, tk)

        self.n_relations = n_relations
        self.n_dst, self.n_src, self.d = n_dst, n_src, d
        self.d_p, self.deg_col = d_p, deg_col
        self.tm, self.tk = tm, tk
        self.n_dst_p, self.n_src_p = n_dst_p, n_src_p
        self.dim_flag1 = [int(v) for v in dim_flag1]

        # 1-byte 0/1 adjacency in HBM (halves the dominant stream vs bf16); padded rows /
        # cols are zero so they contribute nothing to sums or degrees.
        self.adj_p = jnp.pad(adjs.astype(jnp.int8),
                             ((0, 0), (0, n_dst_p - n_dst), (0, n_src_p - n_src)))
        self.flags = jnp.asarray(self.dim_flag1, dtype=jnp.int32)

        m_tiles = n_dst_p // tm
        k_tiles = n_src_p // tk
        # Relation innermost: X's block index (k, 0) is unchanged while r varies, so
        # Pallas skips the X re-DMA R-1 times out of R.
        grid = (m_tiles, k_tiles, n_relations)

        cost = pl.CostEstimate(
            flops=int(2 * n_relations * n_dst_p * n_src_p * d_p),
            transcendentals=0,
            bytes_accessed=int(self.adj_p.size                  # int8 adjacency, once
                               + m_tiles * n_src_p * d_p * 2    # bf16 X, once per dst tile
                               + n_dst_p * d_p * 4),            # fused f32 output, once
        )

        kernel = functools.partial(_edge_encoder_kernel, deg_col=deg_col)
        self._call = pl.pallas_call(
            kernel,
            out_shape=jax.ShapeDtypeStruct((n_dst_p, d_p), jnp.float32),
            grid_spec=pltpu.PrefetchScalarGridSpec(
                num_scalar_prefetch=1,
                grid=grid,
                in_specs=[
                    # relation-r adjacency tile: (tm dst rows) x (tk src cols), int8.
                    # TODO(synk): if DMA is still exposed on v6e after the grid reorder /
                    # larger tiles, add pipeline_mode=pl.Buffered(3) here.
                    pl.BlockSpec((pl.Squeezed(), tm, tk),
                                 lambda i, k, r, fl: (r, i, k)),
                    # full-width bf16 embedding K-slice, shared by all relations.
                    pl.BlockSpec((tk, d_p), lambda i, k, r, fl: (k, 0)),
                ],
                # single lane-dense output tile, resident across the k and r axes.
                out_specs=pl.BlockSpec((tm, d_p), lambda i, k, r, fl: (i, 0)),
                scratch_shapes=[
                    # per-relation A_r @ X accumulator slab (includes the degree column).
                    pltpu.VMEM((n_relations, tm, d_p), jnp.float32),
                ],
            ),
            compiler_params=pltpu.CompilerParams(
                dimension_semantics=("parallel", "arbitrary", "arbitrary"),
                vmem_limit_bytes=32 * 1024 * 1024,   # safe on v5e/v6e/v7x, ample headroom
            ),
            cost_estimate=cost,
        )

    def __call__(self, entity_emb):
        assert entity_emb.shape == (self.n_src, self.d)
        # bf16 X for the native MXU bf16 path; the `deg_col` padding column is set to 1.0
        # so the matmul accumulates the in-degree exactly in f32.
        x_p = jnp.pad(entity_emb.astype(jnp.bfloat16),
                      ((0, self.n_src_p - self.n_src), (0, self.d_p - self.d)))
        x_p = x_p.at[:, self.deg_col].set(1.0)
        out_p = self._call(self.flags, self.adj_p, x_p)
        entity_emb_f = out_p[:self.n_dst, :self.d]
        edge_emb = [entity_emb_f[:, self.dim_flag1[i]:self.dim_flag1[i + 1]]
                    for i in range(self.n_relations)]
        return entity_emb_f, edge_emb


if __name__ == "__main__":
    # Small deterministic synthetic problem consistent with the module's forward
    # (src/dst node type is 'item' for every relation, so all graphs share n_nodes).
    n_nodes = 256                 # 2 dst tiles x 2 K tiles at tm=tk=128
    n_relations = 3
    dim_flag1 = [0, 16, 32, 64]   # per-relation column slices of entity_emb
    emb_dim = dim_flag1[-1]

    key = jax.random.PRNGKey(0)
    k_emb, k_adj = jax.random.split(key)

    # Precision contract: the kernel multiplies on the MXU in bf16.  Quantizing the test
    # embeddings to multiples of 1/4 (exactly representable in bf16) makes the bf16 path
    # exact, so the comparison against the f32 reference only sees the ~1-2 ulp of the
    # reciprocal-multiply normalization; with arbitrary f32 inputs expect bf16-ulp-level
    # differences and loosen the tolerance accordingly.
    entity_emb = (jnp.round(jax.random.normal(k_emb, (n_nodes, emb_dim)) * 4.0) / 4.0
                  ).astype(jnp.float32)
    # Random sparse-ish 0/1 adjacency per relation (dense representation).
    adjs = (jax.random.uniform(k_adj, (n_relations, n_nodes, n_nodes)) < 0.1
            ).astype(jnp.float32)

    # tm/tk shrunk from the production defaults (512/512) so the toy problem exercises a
    # multi-step grid on every axis: 2 dst tiles x 2 K tiles x 3 relations.
    encoder = EdgeEncoder(adjs, dim_flag1, tm=128, tk=128)
    entity_emb_f, edge_emb = encoder(entity_emb)
    jax.block_until_ready(entity_emb_f)

    # Pure-JAX reference of the DGL mean aggregation semantics.
    refs = []
    for i in range(n_relations):
        x_i = entity_emb[:, dim_flag1[i]:dim_flag1[i + 1]]
        s = adjs[i] @ x_i
        deg = adjs[i].sum(axis=1, keepdims=True)
        refs.append(jnp.where(deg > 0, s / jnp.maximum(deg, 1.0), 0.0))
    ref_f = jnp.concatenate(refs, axis=1)

    assert entity_emb_f.shape == (n_nodes, emb_dim)
    for i in range(n_relations):
        assert edge_emb[i].shape == (n_nodes, dim_flag1[i + 1] - dim_flag1[i])
    assert jnp.allclose(entity_emb_f, ref_f, atol=1e-5, rtol=1e-5)
    assert jnp.allclose(jnp.concatenate(edge_emb, axis=1), ref_f, atol=1e-5, rtol=1e-5)

    print("KERNEL_OK")
</pallas_src>

<mosaic_0001>
module attributes {stable_mosaic.version = 11 : i64} {
  func.func @_edge_encoder_kernel(%arg0: i32, %arg1: i32, %arg2: i32, %arg3: memref<4xi32, #tpu.memory_space<smem>>, %arg4: memref<1x128x128xi8, #tpu.memory_space<vmem>>, %arg5: memref<128x128xbf16, #tpu.memory_space<vmem>>, %arg6: memref<128x128xf32, #tpu.memory_space<vmem>>, %arg7: memref<3x128x128xf32, #tpu.memory_space<vmem>>) attributes {dimension_semantics = [#tpu.dimension_semantics<parallel>, #tpu.dimension_semantics<arbitrary>, #tpu.dimension_semantics<arbitrary>], iteration_bounds = array<i64: 2, 2, 3>, scalar_prefetch = 1 : i64, scratch_operands = 1 : i64, tpu.core_type = #tpu.core_type<tc>, window_params = [{transform_indices = @transform_0, window_bounds = array<i64: 1, 128, 128>}, {transform_indices = @transform_1, window_bounds = array<i64: 128, 128>}, {transform_indices = @transform_2, window_bounds = array<i64: 128, 128>}]} {
    %c0 = arith.constant 0 : index
    %c0_0 = arith.constant 0 : index
    %c0_1 = arith.constant 0 : index
    %0 = vector.load %arg4[%c0, %c0_0, %c0_1] : memref<1x128x128xi8, #tpu.memory_space<vmem>>, vector<1x128x128xi8>
    %1 = vector.shape_cast %0 : vector<1x128x128xi8> to vector<128x128xi8>
    %2 = arith.sitofp %1 : vector<128x128xi8> to vector<128x128xbf16>
    %c0_2 = arith.constant 0 : index
    %c0_3 = arith.constant 0 : index
    %3 = vector.load %arg5[%c0_2, %c0_3] : memref<128x128xbf16, #tpu.memory_space<vmem>>, vector<128x128xbf16>
    %cst = arith.constant dense<0.000000e+00> : vector<128x128xf32>
    %4 = tpu.matmul %2, %3, %cst {dimension_numbers = #tpu.dot_dimension_numbers<[1], [0], [0], [1], [0, 0, 1, 1], [], []>} : vector<128x128xbf16>, vector<128x128xbf16>, vector<128x128xf32> -> vector<128x128xf32>
    %c0_i32 = arith.constant 0 : i32
    %5 = arith.cmpi eq, %arg1, %c0_i32 : i32
    %6 = arith.extui %5 : i1 to i32
    %c0_i32_4 = arith.constant 0 : i32
    %7 = arith.cmpi ne, %6, %c0_i32_4 : i32
    scf.if %7 {
      %14 = arith.index_cast %arg2 : i32 to index
      %c0_8 = arith.constant 0 : index
      %c0_9 = arith.constant 0 : index
      %15 = vector.load %arg7[%14, %c0_8, %c0_9] : memref<3x128x128xf32, #tpu.memory_space<vmem>>, vector<1x128x128xf32>
      %16 = vector.shape_cast %15 : vector<1x128x128xf32> to vector<128x128xf32>
      %17 = vector.shape_cast %4 : vector<128x128xf32> to vector<1x128x128xf32>
      tpu.vector_store %arg7[%14, %c0_8, %c0_9], %17 {strides = array<i32>} : memref<3x128x128xf32, #tpu.memory_space<vmem>>, vector<1x128x128xf32>,
    } else {
    }
    %c0_i32_5 = arith.constant 0 : i32
    %8 = arith.cmpi sgt, %arg1, %c0_i32_5 : i32
    %9 = arith.extui %8 : i1 to i32
    %c0_i32_6 = arith.constant 0 : i32
    %10 = arith.cmpi ne, %9, %c0_i32_6 : i32
    scf.if %10 {
      %14 = arith.index_cast %arg2 : i32 to index
      %c0_8 = arith.constant 0 : index
      %c0_9 = arith.constant 0 : index
      %15 = vector.load %arg7[%14, %c0_8, %c0_9] : memref<3x128x128xf32, #tpu.memory_space<vmem>>, vector<1x128x128xf32>
      %16 = vector.shape_cast %15 : vector<1x128x128xf32> to vector<128x128xf32>
      %17 = arith.addf %16, %4 : vector<128x128xf32>
      %18 = arith.index_cast %arg2 : i32 to index
      %c0_10 = arith.constant 0 : index
      %c0_11 = arith.constant 0 : index
      %19 = vector.load %arg7[%18, %c0_10, %c0_11] : memref<3x128x128xf32, #tpu.memory_space<vmem>>, vector<1x128x128xf32>
      %20 = vector.shape_cast %19 : vector<1x128x128xf32> to vector<128x128xf32>
      %21 = vector.shape_cast %17 : vector<128x128xf32> to vector<1x128x128xf32>
      tpu.vector_store %arg7[%18, %c0_10, %c0_11], %21 {strides = array<i32>} : memref<3x128x128xf32, #tpu.memory_space<vmem>>, vector<1x128x128xf32>,
    } else {
    }
    %c1_i32 = arith.constant 1 : i32
    %11 = arith.cmpi eq, %arg1, %c1_i32 : i32
    %12 = arith.extui %11 : i1 to i32
    %c0_i32_7 = arith.constant 0 : i32
    %13 = arith.cmpi ne, %12, %c0_i32_7 : i32
    scf.if %13 {
      %14 = arith.index_cast %arg2 : i32 to index
      %c0_8 = arith.constant 0 : index
      %c0_9 = arith.constant 0 : index
      %15 = vector.load %arg7[%14, %c0_8, %c0_9] : memref<3x128x128xf32, #tpu.memory_space<vmem>>, vector<1x128x128xf32>
      %16 = vector.shape_cast %15 : vector<1x128x128xf32> to vector<128x128xf32>
      %17 = vector.extract_strided_slice %16 {offsets = [0, 64], sizes = [128, 1], strides = [1, 1]} : vector<128x128xf32> to vector<128x1xf32>
      %cst_10 = arith.constant 0.000000e+00 : f32
      %18 = vector.broadcast %cst_10 : f32 to vector<128x1xf32>
      %19 = arith.cmpf ogt, %17, %18 : vector<128x1xf32>
      %cst_11 = arith.constant 1.000000e+00 : f32
      %20 = vector.broadcast %cst_11 : f32 to vector<128x1xf32>
      %21 = arith.maximumf %17, %20 : vector<128x1xf32>
      %cst_12 = arith.constant 1.000000e+00 : f32
      %22 = vector.broadcast %cst_12 : f32 to vector<128x1xf32>
      %23 = arith.divf %22, %21 : vector<128x1xf32>
      %cst_13 = arith.constant 0.000000e+00 : f32
      %24 = vector.broadcast %cst_13 : f32 to vector<128x1xf32>
      %25 = arith.select %19, %23, %24 : vector<128x1xi1>, vector<128x1xf32>
      %26 = arith.index_cast %arg2 : i32 to index
      %27 = memref.load %arg3[%26] : memref<4xi32, #tpu.memory_space<smem>>
      %c1_i32_14 = arith.constant 1 : i32
      %28 = arith.addi %arg2, %c1_i32_14 : i32
      %29 = arith.index_cast %28 : i32 to index
      %30 = memref.load %arg3[%29] : memref<4xi32, #tpu.memory_space<smem>>
      %31 = tpu.iota {dimensions = array<i32: 1>} : vector<128x128xi32>
      %32 = vector.broadcast %27 : i32 to vector<128x128xi32>
      %33 = arith.cmpi sge, %31, %32 : vector<128x128xi32>
      %34 = vector.broadcast %30 : i32 to vector<128x128xi32>
      %35 = arith.cmpi slt, %31, %34 : vector<128x128xi32>
      %36 = arith.andi %33, %35 : vector<128x128xi1>
      %37 = vector.broadcast %25 : vector<128x1xf32> to vector<128x128xf32>
      %38 = arith.mulf %16, %37 : vector<128x128xf32>
      %cst_15 = arith.constant 0.000000e+00 : f32
      %39 = vector.broadcast %cst_15 : f32 to vector<128x128xf32>
      %40 = arith.select %36, %38, %39 : vector<128x128xi1>, vector<128x128xf32>
      %c0_i32_16 = arith.constant 0 : i32
      %41 = arith.cmpi eq, %arg2, %c0_i32_16 : i32
      %42 = arith.extui %41 : i1 to i32
      %c0_i32_17 = arith.constant 0 : i32
      %43 = arith.cmpi ne, %42, %c0_i32_17 : i32
      scf.if %43 {
        %c0_20 = arith.constant 0 : index
        %c0_21 = arith.constant 0 : index
        %47 = vector.load %arg6[%c0_20, %c0_21] : memref<128x128xf32, #tpu.memory_space<vmem>>, vector<128x128xf32>
        tpu.vector_store %arg6[%c0_20, %c0_21], %40 {strides = array<i32>} : memref<128x128xf32, #tpu.memory_space<vmem>>, vector<128x128xf32>,
      } else {
      }
      %c0_i32_18 = arith.constant 0 : i32
      %44 = arith.cmpi sgt, %arg2, %c0_i32_18 : i32
      %45 = arith.extui %44 : i1 to i32
      %c0_i32_19 = arith.constant 0 : i32
      %46 = arith.cmpi ne, %45, %c0_i32_19 : i32
      scf.if %46 {
        %c0_20 = arith.constant 0 : index
        %c0_21 = arith.constant 0 : index
        %47 = vector.load %arg6[%c0_20, %c0_21] : memref<128x128xf32, #tpu.memory_space<vmem>>, vector<128x128xf32>
        %48 = arith.addf %47, %40 : vector<128x128xf32>
        %c0_22 = arith.constant 0 : index
        %c0_23 = arith.constant 0 : index
        %49 = vector.load %arg6[%c0_22, %c0_23] : memref<128x128xf32, #tpu.memory_space<vmem>>, vector<128x128xf32>
        tpu.vector_store %arg6[%c0_22, %c0_23], %48 {strides = array<i32>} : memref<128x128xf32, #tpu.memory_space<vmem>>, vector<128x128xf32>,
      } else {
      }
    } else {
    }
    return
  }
  func.func @transform_0(%arg0: i32, %arg1: i32, %arg2: i32, %arg3: memref<4xi32, #tpu.memory_space<smem>>) -> (i32, i32, i32) {
    %c0_i32 = arith.constant 0 : i32
    return %arg2, %arg0, %arg1 : i32, i32, i32
  }
  func.func @transform_1(%arg0: i32, %arg1: i32, %arg2: i32, %arg3: memref<4xi32, #tpu.memory_space<smem>>) -> (i32, i32) {
    %c0_i32 = arith.constant 0 : i32
    %c0_i32_0 = arith.constant 0 : i32
    return %arg1, %c0_i32 : i32, i32
  }
  func.func @transform_2(%arg0: i32, %arg1: i32, %arg2: i32, %arg3: memref<4xi32, #tpu.memory_space<smem>>) -> (i32, i32) {
    %c0_i32 = arith.constant 0 : i32
    %c0_i32_0 = arith.constant 0 : i32
    return %arg0, %c0_i32 : i32, i32
  }
}

</mosaic_0001>

<bundles_post_ra>
// kernel: tpu_custom_call.1
= control target key start
LH: loop header
LB: loop body
LE: loop exit
PB: predicated region body
PF: predicated region fallthrough
CT: control target
= control target key end

     0   :  { %s2185_s0 = inlined_call_operand.hbm [shape: s32[4], index: 0, kind: input, shape index: {}]   ;;  %s2186_s1 = inlined_call_operand.hbm [shape: s8[3,256,256], index: 1, kind: input, shape index: {}]   ;;  %s2187_s2 = inlined_call_operand.hbm [shape: bf16[256,128], index: 2, kind: input, shape index: {}]   ;;  %s2188_s3 = inlined_call_operand.hbm [shape: f32[256,128], index: 3, kind: output, shape index: {}]  }
   0x1   :  { %2202 = sst [smem:[#allocation24_spill]] %s2186_s1  ;;  %s1222_s14 = scalar_lea.hbm %s2185_s0, 16 }
   0x2   :  { %2203 = sst [smem:[#allocation25_spill]] %s2187_s2  ;;  %p1223_p0 = scmp.ne.s32.totalorder %s2185_s0, %s1222_s14 }
   0x3   :  { %2204 = sst [smem:[#allocation26_spill]] %s2188_s3  ;;  %p1226_p1 = scmp.lt.u32.totalorder %s1222_s14, %s2185_s0 }
   0x5   :  { %p1228_p2 = pnand %p1226_p1, %p1223_p0 }
   0x7   :  { %1231 = shalt.err (!%p1228_p2)  }
   0x8   :  { %s1462_s19 = smov [#allocation4]  }
   0x9   :  { %9 = dma.hbm_to_smem %s2185_s0, 16, %s1462_s19, [#allocation3] }
   0xa   :  { %1384 = dma.done.wait [#allocation3], 16 }
   0xb   :  { %1385 = vsyncadd [#allocation3], 4294967280 }
   0xc   :  { %11 = sfence }
   0xd   :  { %12 = vsyncpa [#allocation6], 0 }
   0xe   :  { %14 = vsyncpa [#allocation6 + $0x1], 0 }
   0xf   :  { %15 = vsyncpa [#allocation9], 0 }
  0x10   :  { %17 = vsyncpa [#allocation9 + $0x1], 0 }
  0x11   :  { %18 = vsyncpa [#allocation7], 0 }
  0x12   :  { %20 = vsyncpa [#allocation7 + $0x1], 0  ;;  %s1506_s22 = smov 0   ;;  %s1508_s23 = smov 0  }
  0x13   :  { %s1510_s24 = smov 0   ;;  %s1512_s25 = smov 0  }
  0x14   :  { %s1514_s26 = smov 0   ;;  %s1516_s0 = smov 0  }
  0x15   :  { %s1518_s27 = smov 0   ;;  %s1520_s28 = smov 0  }
  0x16   :  { %s1522_s29 = smov 0   ;;  %s1524_s30 = smov 0  }
  0x17   :  { %s1526_s4 = smov 0   ;;  %s1528_s5 = smov 0  }
  0x18   :  { %s1530_s6 = smov 0   ;;  %s1532_s7 = smov 0  }
  0x19   :  { %s1534_s8 = smov 0   ;;  %s1536_s9 = smov 0  }
  0x1a LB: > { %2205 = sst [smem:[#allocation15_spill]] %s1400_s22  ;;  %s38_s10 = sadd.s32 1, %s1448_s6  ;;  %s1460_s9 = sphi %s1536_s9, %s26_s9   ;;  %s1456_s8 = sphi %s1534_s8, %s2269_s8   ;;  %s1452_s7 = sphi %s1532_s7, %s2268_s7   ;;  %s1448_s6 = sphi %s1530_s6, %s2267_s6   ;;  %s1444_s5 = sphi %s1528_s5, %s2266_s5   ;;  %s1440_s4 = sphi %s1526_s4, %s2265_s4   ;;  %s1436_s30 = sphi %s1524_s30, %s2264_s30   ;;  %s1432_s29 = sphi %s1522_s29, %s2263_s29   ;;  %s1428_s28 = sphi %s1520_s28, %s2262_s28   ;;  %s1424_s27 = sphi %s1518_s27, %s2261_s27   ;;  %s1420_s0 = sphi %s1516_s0, %s2260_s0   ;;  %s1416_s26 = sphi %s1514_s26, %s2259_s26   ;;  %s1412_s25 = sphi %s1512_s25, %s2258_s25   ;;  %s1408_s24 = sphi %s1510_s24, %s2257_s24   ;;  %s1404_s23 = sphi %s1508_s23, %s2256_s23   ;;  %s1400_s22 = sphi %s1506_s22, %s2252_s22  }
  0x1b   : > { %2206 = sst [smem:[#allocation16_spill]] %s1404_s23  ;;  %s41_s11 = sadd.s32 1, %s1452_s7 }
  0x1c   : > { %2207 = sst [smem:[#allocation17_spill]] %s1412_s25  ;;  %p39_p3 = scmp.ge.s32.totalorder %s38_s10, 3 }
  0x1d   : > { %2208 = sst [smem:[#allocation18_spill]] %s1436_s30  ;;  %s45_s12 = sadd.s32 1, %s1456_s8 }
  0x1e   : > { %2209 = sst [smem:[#allocation19_spill]] %s1440_s4  ;;  %s56_s13 = sadd.s32 1, %s1432_s29 }
  0x1f   : > { %2210 = sst [smem:[#allocation20_spill]] %s1444_s5  ;;  %p63_p4 = scmp.ne.s32.totalorder %s1432_s29, %s1428_s28 }
  0x20   : > { %s2271_s10 = smov (%p39_p3, %s38_s10), 0  ;;  %s2273_s11 = smov (!%p39_p3, %s41_s11), %s1452_s7 }
  0x21   : > { %2211 = sst [smem:[#allocation21_spill]] %s2271_s10  ;;  %s49_s14 = ssub.s32 %s1448_s6, %s2271_s10 }
  0x22   : > { %p2197_p5 = scmp.eq.s32.totalorder %s1460_s9, 0  ;;  %p43_p6 = scmp.ge.s32.totalorder %s2273_s11, 2 }
  0x23   : > { %s108_s16 = sadd.s32 1, %s1408_s24  ;;  %p2196_p11 = scmp.lt.s32.totalorder %s1460_s9, 12 }
  0x24   : > { %p1602_p8 = por %p2197_p5, %p63_p4  ;;  %s2275_s11 = smov (%p43_p6, %s2273_s11), 0 }
  0x25   : > { %2213 = sst [smem:[#allocation22_spill]] %s2275_s11  ;;  %s2277_s12 = smov (!%p43_p6, %s45_s12), %s1456_s8 }
  0x26   : > { %s1612_s17 = ssub.s32 %s1452_s7, %s2275_s11  ;;  %p47_p9 = scmp.ge.s32.totalorder %s2277_s12, 2 }
  0x27   : > { %s145_s18 = sand.u32 1, %s1432_s29   ;;  %s957_s11 = sshll.u32 %s1456_s8, 3 }
  0x28   : > { %s2279_s12 = smov (%p47_p9, %s2277_s12), 0  ;;  %s924_s19 = sshll.u32 %s145_s18, 5 }
  0x29   : > { %2214 = sst [smem:[#allocation23_spill]] %s2279_s12  ;;  %s50_s20 = ssub.s32 %s1456_s8, %s2279_s12 }
  0x2a   : > { %s51_s21 = sor.u32 %s50_s20, %s49_s14  ;;  %p106_p12 = scmp.eq.s32.totalorder %s50_s20, 0 }
  0x2b   : > { %s53_s10 = sor.u32 %s1612_s17, %s51_s21  ;;  %s155_s3 = sadd.s32 %s1452_s7, %s957_s11 }
  0x2c   : > { %p54_p13 = scmp.eq.s32.totalorder %s53_s10, 0  ;;  %s927_s4 = sshll.u32 %s1448_s6, 4 }
  0x2d   : > { %s1625_s5 = scalar_select %p106_p12, %s1408_s24, %s108_s16  }
  0x2e   : > { %s1628_s30 = scalar_select %p54_p13, %s1432_s29, %s56_s13  }
  0x2f   : > { %s149_s2 = scalar_lea.vmem [#allocation5], %s924_s19  ;;  %s157_s23 = sadd.s32 %s927_s4, %s155_s3 }
  0x30   : > { %s160_s22 = sshll.u32 %s149_s2, 4  ;;  %s928_s25 = sshll.u32 %s157_s23, 7  ;;  %s1631_s22 = int_to_ptr.vmem [resolvable:$true] %s160_s22 }
  0x31   : > { %p1637_p0 = pnand %p2196_p11, %p1602_p8  ;;  %s2216_s1 = sld [smem:[#allocation24_spill]] }
  0x32   : > { %p932_p1 = scmp.ge.s32.totalorder %s1460_s9, 1  ;;  %s1647_s2 = scalar_lea.sflag [#allocation6], %s145_s18 }
  0x33   : > { %p1234_p3 = pneg %p1637_p0 }
  0x37   : > { %s1644_s11 = scalar_lea.hbm %s2216_s1, %s928_s25  ;;  %s1237_s25 = scalar_lea.hbm %s2216_s1, 6144 }
  0x38   : > { %s1232_s3 = scalar_lea.hbm %s1644_s11, 512  ;;  %p1238_p8 = scmp.lt.u32.totalorder %s1644_s11, %s2216_s1 }
  0x39   : > { %p1233_p2 = scmp.ne.s32.totalorder %s1644_s11, %s1232_s3  ;;  %p1239_p9 = scmp.lt.u32.totalorder %s1237_s25, %s1232_s3 }
  0x3a   : > { %p1241_p13 = scmp.lt.u32.totalorder %s1232_s3, %s1644_s11 }
  0x3b   : > { %p1235_p4 = pnand %p1234_p3, %p1233_p2  ;;  %p1240_p12 = por %p1239_p9, %p1238_p8 }
  0x3d   : > { %p1236_p6 = pneg %p1235_p4  ;;  %p1242_p11 = por %p1241_p13, %p1240_p12 }
  0x3f   : > { %p1243_p5 = pnand %p1242_p11, %p1236_p6 }
  0x41   : > { %1246 = shalt.err (!%p1243_p5)
}
  0x42   : > { %s1247_s16 = scalar_lea.vmem %s1631_s22, 512  ;;  %s1463_s18 = smov [#allocation5]  }
  0x43   : > { %p1248_p2 = scmp.ne.s32.totalorder %s1631_s22, %s1247_s16  ;;  %s1252_s19 = sshll.u32 %s1463_s18, 4  ;;  %s1253_s19 = int_to_ptr.vmem [resolvable:$false] %s1252_s19 }
  0x44   : > { %s1254_s21 = scalar_lea.vmem %s1253_s19, 1024  ;;  %p1255_p10 = scmp.lt.s32.totalorder %s1631_s22, %s1253_s19 }
  0x45   : > { %p1250_p4 = pnand %p1248_p2, %p1234_p3  ;;  %p1256_p8 = scmp.lt.s32.totalorder %s1254_s21, %s1247_s16 }
  0x47   : > { %p1251_p7 = pneg %p1250_p4  ;;  %p1257_p9 = por %p1256_p8, %p1255_p10 }
  0x49   : > { %p1258_p12 = pnand %p1257_p9, %p1251_p7 }
  0x4b   : > { %1261 = shalt.err (!%p1258_p12)
}
  0x4c   : > { %s1464_s20 = smov 256   ;;  %s2217_s10 = sld [smem:[#allocation17_spill]] }
  0x4d   : > { %s2218_s3 = sld [smem:[#allocation16_spill]]  ;;  %s1465_s23 = smov 128  }
  0x4e   : > { %s1466_s4 = smov 8   ;;  %s2219_s25 = sld [smem:[#allocation15_spill]] }
  0x4f   : > { %1033 = dma.hbm_to_vmem [thread:$0]  (!%p1637_p0), %s1644_s11, 512, %s1631_s22, %s1647_s2, %s1464_s20, %s1465_s23, %s1466_s4  }
  0x50   : > { %p189_p5 = scmp.lt.s32.totalorder %s1460_s9, 13  ;;  %s920_s15 = sadd.s32 4294967295, %s1460_s9  }
  0x51   : > { %s921_s16 = sadd.s32 4294967294, %s1460_s9   ;;  %p70_p10 = scmp.eq.s32.totalorder %s920_s15, 0 }
  0x52   : > { %p1678_p7 = pnand %p932_p1, %p189_p5  ;;  %s82_s18 = sadd.s32 1, %s1420_s0 }
  0x53   : > { %p2221_p11 = scmp.eq.s32.totalorder %s1612_s17, 0  ;;  %p2222_p3 = scmp.ne.s32.totalorder %s1428_s28, %s1424_s27 }
  0x54   : > { %p89_p0 = scmp.ne.s32.totalorder %s1420_s0, %s1416_s26  ;;  %p95_p1 = scmp.ne.s32.totalorder %s1416_s26, %s2217_s10 }
  0x55   : > { %s1688_s19 = scalar_select %p2221_p11, %s1420_s0, %s82_s18  }
  0x56   : > { %p1693_p6 = por %p70_p10, %p2222_p3  ;;  %p118_p13 = scmp.ne.s32.totalorder %s1408_s24, %s2218_s3 }
  0x57   : > { %p2224_p2 = scmp.eq.s32.totalorder %s1460_s9, 0  ;;  %p119_p8 = scmp.eq.s32.totalorder %s920_s15, 11 }
  0x58   : > { %s2223_s14 = scalar_select %p1693_p6, 1, 0 }
  0x59   : > { %p91_p4 = por %p89_p0, %p2224_p2  ;;  %p1705_p9 = por %p95_p1, %p70_p10 }
  0x5a   : > { %p124_p12 = scmp.ne.s32.totalorder %s2218_s3, %s2219_s25  ;;  %p1711_p5 = por %p119_p8, %p118_p13 }
  0x5b   : > { %s2225_s22 = scalar_select %p1705_p9, 1, 0 }
  0x5c   : > { %s2226_s17 = scalar_select %p1711_p5, 1, 0 }
  0x5d   : > { %p125_p11 = scmp.eq.s32.totalorder %s921_s16, 11  ;;  %s170_s27 = sand.u32 1, %s1420_s0  }
  0x5e   : > { %s958_s11 = sshll.u32 %s1452_s7, 10  ;;  %s929_s21 = sshll.u32 %s170_s27, 6 }
  0x5f   : > { %p1717_p3 = por %p125_p11, %p124_p12  ;;  %s2228_s23 = sld [smem:[#allocation25_spill]] }
  0x60   : > { %p2230_p10 = scmp.lt.s32.totalorder %s1460_s9, 12  ;;  %s174_s25 = scalar_lea.vmem [#allocation8], %s929_s21 }
  0x61   : > { %s2227_s2 = scalar_select %p1717_p3, 1, 0 }
  0x62   : > { %p1728_p0 = pnand %p2230_p10, %p91_p4  ;;  %s181_s16 = sshll.u32 %s174_s25, 4  ;;  %s1732_s16 = int_to_ptr.vmem [resolvable:$true] %s181_s16 }
  0x63   : > { %s1734_s18 = scalar_lea.sflag [#allocation9], %s170_s27 }
  0x64   : > { %p1264_p13 = pneg %p1728_p0 }
  0x65   : > { %s2229_s15 = smov %s2228_s23  ;;  %s1724_s4 = scalar_lea.hbm %s2228_s23, %s958_s11 }
  0x66   : > { %s1262_s20 = scalar_lea.hbm %s1724_s4, 1024  ;;  %s1267_s23 = scalar_lea.hbm %s2229_s15, 2048 }
  0x67   : > { %p1263_p1 = scmp.ne.s32.totalorder %s1724_s4, %s1262_s20  ;;  %p1268_p4 = scmp.lt.u32.totalorder %s1724_s4, %s2229_s15 }
  0x68   : > { %p1269_p12 = scmp.lt.u32.totalorder %s1267_s23, %s1262_s20  ;;  %p1271_p10 = scmp.lt.u32.totalorder %s1262_s20, %s1724_s4 }
  0x69   : > { %p1265_p2 = pnand %p1264_p13, %p1263_p1 }
  0x6a   : > { %p1270_p11 = por %p1269_p12, %p1268_p4 }
  0x6b   : > { %p1266_p8 = pneg %p1265_p2 }
  0x6c   : > { %p1272_p3 = por %p1271_p10, %p1270_p11 }
  0x6e   : > { %p1273_p5 = pnand %p1272_p3, %p1266_p8 }
  0x70   : > { %1276 = shalt.err (!%p1273_p5)
}
  0x71   : > { %s1277_s27 = scalar_lea.vmem %s1732_s16, 1024  ;;  %s1467_s21 = smov [#allocation8]  }
  0x72   : > { %p1278_p1 = scmp.ne.s32.totalorder %s1732_s16, %s1277_s27  ;;  %s1282_s25 = sshll.u32 %s1467_s21, 4  ;;  %s1283_s25 = int_to_ptr.vmem [resolvable:$false] %s1282_s25 }
  0x73   : > { %s1284_s1 = scalar_lea.vmem %s1283_s25, 2048  ;;  %p1285_p6 = scmp.lt.s32.totalorder %s1732_s16, %s1283_s25 }
  0x74   : > { %p1280_p2 = pnand %p1278_p1, %p1264_p13  ;;  %p1286_p4 = scmp.lt.s32.totalorder %s1284_s1, %s1277_s27 }
  0x76   : > { %p1281_p9 = pneg %p1280_p2  ;;  %p1287_p12 = por %p1286_p4, %p1285_p6 }
  0x78   : > { %p1288_p11 = pnand %p1287_p12, %p1281_p9 }
  0x7a   : > { %1291 = shalt.err (!%p1288_p11)
}
  0x7b   : > { %s1468_s12 = smov 64   ;;  %s1469_s20 = smov 4  }
  0x7c   : > { %1036 = dma.hbm_to_vmem [thread:$0]  (!%p1728_p0), %s1724_s4, 1024, %s1732_s16, %s1734_s18, %s1468_s12, %s1468_s12, %s1469_s20  }
  0x7d   : > { %193 = sbr.rel (%p1678_p7) target bundleno = 657 (0x291), region = 28  ;;  %s195_s11 = sand.u32 (!%p1678_p7), 1, %s1428_s28  }
  0x7e   : > { %s933_s10 = sshll.u32 (!%p1678_p7), %s195_s11, 5  ;;  %s196_s23 = scalar_lea.sflag (!%p1678_p7), [#allocation6], %s195_s11 }
  0x7f   : > { %s1765_s27 = scalar_lea.vmem (!%p1678_p7), [#allocation5], %s933_s10  ;;  %p2232_p6 = scmp.ne.s32.totalorder (!%p1678_p7), %s2223_s14, 0 }
  0x84   : > { %1387 = dma.done.wait (%p2232_p6), %s196_s23, 512  }
  0x85   : > { %1389 = vsyncadd (%p2232_p6), %s196_s23, 4294966784  ;;  %s204_s21 = sand.u32 1, %s1416_s26   ;;  %p2233_p7 = scmp.ne.s32.totalorder %s2225_s22, 0 }
  0x86   : > { %s934_s3 = sshll.u32 %s204_s21, 6  ;;  %s205_s4 = scalar_lea.sflag [#allocation9], %s204_s21 }
  0x87   : > { %s1772_s16 = scalar_lea.vmem [#allocation8], %s934_s3 }
  0x88   : > { %1391 = dma.done.wait (%p2233_p7), %s205_s4, 1024  }
  0x89   : > { %1393 = vsyncadd (%p2233_p7), %s205_s4, 4294966272  ;;  %s2234_s13 = sld [smem:[#allocation16_spill]]  ;;  %v1180_v0 = vld [vmem:[%s1772_s16] sm:$0xff]   ;;  %v1181_v1 = vld [vmem:[%s1772_s16 + $0x8] sm:$0xff]   ;;  %s2235_s25 = sld [smem:[#allocation19_spill]] }
  0x8a   : > { %976 = vmatprep.subr.bf16.mxu0 %v1180_v0  ;;  %1008 = vmatprep.subr.bf16.mxu1 %v1180_v0  ;;  %v1182_v2 = vld [vmem:[%s1772_s16 + $0x10] sm:$0xff]   ;;  %v1183_v3 = vld [vmem:[%s1772_s16 + $0x18] sm:$0xff]   ;;  %v238_v4 = vld [vmem:[%s1765_s27] sm:$0xff] }
  0x8b   : > { %977 = vmatpush3.bf16.msra.mxu0 %v1180_v0  ;;  %1016 = vmatpush3.bf16.msra.mxu1 %v1180_v0  ;;  %v240_v5 = vld [vmem:[%s1765_s27 + $0x10] sm:$0xff]  ;;  %v242_v6 = vunpack.c.l.s8.bf16 %v238_v4  ;;  %v1184_v8 = vld [vmem:[%s1772_s16 + $0x20] sm:$0xff]   ;;  %v1185_v9 = vld [vmem:[%s1772_s16 + $0x28] sm:$0xff]   ;;  %v243_v14 = vunpack.c.h.s8.bf16 %v238_v4 }
  0x8c   : > { %978 = vmatprep.subr.bf16.mxu0 %v1181_v1  ;;  %1009 = vmatprep.subr.bf16.mxu1 %v1181_v1  ;;  %v246_v7 = vunpack.c.l.s8.bf16 %v240_v5  ;;  %v1186_v10 = vld [vmem:[%s1772_s16 + $0x30] sm:$0xff]   ;;  %v1187_v11 = vld [vmem:[%s1772_s16 + $0x38] sm:$0xff]   ;;  %v239_v12 = vld [vmem:[%s1765_s27 + $0x8] sm:$0xff]  ;;  %v247_v15 = vunpack.c.h.s8.bf16 %v240_v5 }
  0x8d   : > { %992 = vmatprep.mubr.bf16.mxu0 %v242_v6  ;;  %v241_v13 = vld [vmem:[%s1765_s27 + $0x18] sm:$0xff]  ;;  %v244_v16 = vunpack.c.l.s8.bf16 %v239_v12  ;;  %v245_v18 = vunpack.c.h.s8.bf16 %v239_v12 }
  0x8e   : > { %1000 = vmatprep.mubr.bf16.mxu1 %v246_v7  ;;  %v248_v17 = vunpack.c.l.s8.bf16 %v241_v13  ;;  %v249_v19 = vunpack.c.h.s8.bf16 %v241_v13 }
  0x8f   : > { %s231_s14 = sand.u32 1, %s2234_s13   ;;  %979 = vmatpush3.bf16.msra.mxu0 %v1181_v1  ;;  %1017 = vmatpush3.bf16.msra.mxu1 %v1181_v1  ;;  %p944_p9 = scmp.ne.s32.totalorder %s2235_s25, 0 }
  0x90   : > { %s1781_s18 = sshll.u32 %s231_s14, 7  ;;  %980 = vmatprep.subr.bf16.mxu0 %v1182_v2  ;;  %1010 = vmatprep.subr.bf16.mxu1 %v1182_v2  ;;  %s2236_s1 = sld [smem:[#allocation18_spill]] (!%p944_p9) }
  0x91   : > { %s1808_s22 = scalar_lea.vmem [#allocation10], %s1781_s18 }
  0x93   : > { %981 = vmatpush3.bf16.msra.mxu0 %v1182_v2  ;;  %1018 = vmatpush3.bf16.msra.mxu1 %v1182_v2 }
  0x94   : > { %982 = vmatprep.subr.bf16.mxu0 %v1183_v3  ;;  %1011 = vmatprep.subr.bf16.mxu1 %v1183_v3 }
  0x96   : > { %s945_s12 = sshll.u32 (!%p944_p9), %s2236_s1, 7 }
  0x97   : > { %983 = vmatpush3.bf16.msra.mxu0 %v1183_v3  ;;  %1019 = vmatpush3.bf16.msra.mxu1 %v1183_v3  ;;  %s416_s20 = scalar_lea.vmem (!%p944_p9), [#allocation2], %s945_s12 }
  0x98   : > { %984 = vmatprep.subr.bf16.mxu0 %v1184_v8  ;;  %1012 = vmatprep.subr.bf16.mxu1 %v1184_v8 }
  0x9b   : > { %985 = vmatpush3.bf16.msra.mxu0 %v1184_v8  ;;  %1020 = vmatpush3.bf16.msra.mxu1 %v1184_v8 }
  0x9c   : > { %986 = vmatprep.subr.bf16.mxu0 %v1185_v9  ;;  %1013 = vmatprep.subr.bf16.mxu1 %v1185_v9 }
  0x9f   : > { %987 = vmatpush3.bf16.msra.mxu0 %v1185_v9  ;;  %1021 = vmatpush3.bf16.msra.mxu1 %v1185_v9 }
  0xa0   : > { %988 = vmatprep.subr.bf16.mxu0 %v1186_v10  ;;  %1014 = vmatprep.subr.bf16.mxu1 %v1186_v10 }
  0xa3   : > { %989 = vmatpush3.bf16.msra.mxu0 %v1186_v10  ;;  %1022 = vmatpush3.bf16.msra.mxu1 %v1186_v10 }
  0xa4   : > { %990 = vmatprep.subr.bf16.mxu0 %v1187_v11  ;;  %1015 = vmatprep.subr.bf16.mxu1 %v1187_v11 }
  0xa7   : > { %991 = vmatpush3.bf16.msra.mxu0 %v1187_v11  ;;  %1023 = vmatpush3.bf16.msra.mxu1 %v1187_v11 }
  0xaa   : > { %993 = vmatmul.mubr.bf16.vlgmr.msra.gmra.mrb[0].mxu0 %v243_v14  ;;  %1001 = vmatmul.mubr.bf16.vlgmr.msra.gmra.mrb[0].mxu1 %v247_v15 }
  0xab   : > { %996 = vmatprep.mubr.bf16.mxu0 %v244_v16  ;;  %1004 = vmatprep.mubr.bf16.mxu1 %v248_v17 }
  0xb2   : > { %997 = vmatmul.mubr.bf16.gmra.mrb[4].mxu0 %v245_v18  ;;  %1005 = vmatmul.mubr.bf16.gmra.mrb[4].mxu1 %v249_v19 }
 0x17d   : > { %v994_v20 = vpop.f32.mrb[0].mxu0  ;;  %v1795_v21 = vpop.f32.mrb[0].mxu1 }
 0x17e   : > { %v348_v22 = vpop.f32.mrb[1].mxu0  ;;  %v380_v23 = vpop.f32.mrb[1].mxu1  ;;  %419 = vst [vmem:[%s416_s20 + $0x10] sm:$0xff] (!%p944_p9), %v994_v20  ;;  %427 = vst [vmem:[%s416_s20 + $0x50] sm:$0xff] (!%p944_p9), %v1795_v21 }
 0x17f   : > { %v995_v24 = vpop.f32.mrb[2].mxu0  ;;  %v1797_v25 = vpop.f32.mrb[2].mxu1  ;;  %417 = vst [vmem:[%s416_s20] sm:$0xff] (!%p944_p9), %v348_v22  ;;  %425 = vst [vmem:[%s416_s20 + $0x40] sm:$0xff] (!%p944_p9), %v380_v23 }
 0x180   : > { %v351_v26 = vpop.f32.mrb[3].mxu0  ;;  %v383_v27 = vpop.f32.mrb[3].mxu1  ;;  %420 = vst [vmem:[%s416_s20 + $0x18] sm:$0xff] (!%p944_p9), %v995_v24  ;;  %428 = vst [vmem:[%s416_s20 + $0x58] sm:$0xff] (!%p944_p9), %v1797_v25 }
 0x181   : > { %418 = vst [vmem:[%s416_s20 + $0x8] sm:$0xff] (!%p944_p9), %v351_v26  ;;  %426 = vst [vmem:[%s416_s20 + $0x48] sm:$0xff] (!%p944_p9), %v383_v27 }
 0x182   : > { %414 = sbr.rel (%p944_p9) target bundleno = 394 (0x18a), region = 40 }
 0x185   : > { %v998_v28 = vpop.f32.mrb[4].mxu0  ;;  %v1799_v29 = vpop.f32.mrb[4].mxu1 }
 0x186   : > { %v364_v30 = vpop.f32.mrb[5].mxu0  ;;  %v1801_v31 = vpop.f32.mrb[5].mxu1  ;;  %423 = vst [vmem:[%s416_s20 + $0x30] sm:$0xff] (!%p944_p9), %v998_v28  ;;  %431 = vst [vmem:[%s416_s20 + $0x70] sm:$0xff] (!%p944_p9), %v1799_v29 }
 0x187   : > { %v999_v32 = vpop.f32.mrb[6].mxu0  ;;  %v1803_v33 = vpop.f32.mrb[6].mxu1  ;;  %421 = vst [vmem:[%s416_s20 + $0x20] sm:$0xff] (!%p944_p9), %v364_v30  ;;  %429 = vst [vmem:[%s416_s20 + $0x60] sm:$0xff] (!%p944_p9), %v1801_v31 }
 0x188   : > { %v367_v34 = vpop.f32.mrb[7].mxu0  ;;  %v1805_v35 = vpop.f32.mrb[7].mxu1  ;;  %424 = vst [vmem:[%s416_s20 + $0x38] sm:$0xff] (!%p944_p9), %v999_v32  ;;  %432 = vst [vmem:[%s416_s20 + $0x78] sm:$0xff] (!%p944_p9), %v1803_v33 }
 0x189   : > { %422 = vst [vmem:[%s416_s20 + $0x28] sm:$0xff] %v367_v34  ;;  %430 = vst [vmem:[%s416_s20 + $0x68] sm:$0xff] %v1805_v35 }
 0x18a PF: > { %s2237_s11 = sld [smem:[#allocation19_spill]] }
 0x190   : > { %p946_p5 = scmp.le.s32.totalorder %s2237_s11, 0 }
 0x191   : > { %s2238_s10 = sld [smem:[#allocation18_spill]] (!%p946_p5) }
 0x192   : > { %436 = sbr.rel (%p946_p5) target bundleno = 420 (0x1a4), region = 44 }
 0x197   : > { %s947_s23 = sshll.u32 (!%p946_p5), %s2238_s10, 7 }
 0x198   : > { %s1820_s27 = scalar_lea.vmem (!%p946_p5), [#allocation2], %s947_s23 }
 0x199   : > { %v439_v36 = vld [vmem:[%s1820_s27] sm:$0xff]  ;;  %v440_v37 = vld [vmem:[%s1820_s27 + $0x8] sm:$0xff]  ;;  %v441_v38 = vld [vmem:[%s1820_s27 + $0x10] sm:$0xff] }
 0x19a   : > { %v455_v39 = vadd.f32 %v439_v36, %v348_v22  ;;  %v456_v40 = vadd.f32 %v440_v37, %v351_v26  ;;  %v457_v41 = vadd.f32 %v994_v20, %v441_v38  ;;  %v442_v42 = vld [vmem:[%s1820_s27 + $0x18] sm:$0xff]  ;;  %v443_v43 = vld [vmem:[%s1820_s27 + $0x20] sm:$0xff]  ;;  %v444_v44 = vld [vmem:[%s1820_s27 + $0x28] sm:$0xff] }
 0x19b   : > { %v458_v45 = vadd.f32 %v995_v24, %v442_v42  ;;  %v459_v46 = vadd.f32 %v443_v43, %v364_v30  ;;  %v460_v47 = vadd.f32 %v444_v44, %v367_v34  ;;  %v445_v48 = vld [vmem:[%s1820_s27 + $0x30] sm:$0xff]  ;;  %v446_v49 = vld [vmem:[%s1820_s27 + $0x38] sm:$0xff]  ;;  %v447_v50 = vld [vmem:[%s1820_s27 + $0x40] sm:$0xff] }
 0x19c   : > { %471 = vst [vmem:[%s1820_s27] sm:$0xff] %v455_v39  ;;  %472 = vst [vmem:[%s1820_s27 + $0x8] sm:$0xff] %v456_v40  ;;  %v461_v51 = vadd.f32 %v998_v28, %v445_v48  ;;  %v462_v52 = vadd.f32 %v999_v32, %v446_v49  ;;  %v463_v53 = vadd.f32 %v447_v50, %v380_v23  ;;  %v448_v54 = vld [vmem:[%s1820_s27 + $0x48] sm:$0xff]  ;;  %v449_v55 = vld [vmem:[%s1820_s27 + $0x50] sm:$0xff] }
 0x19d   : > { %473 = vst [vmem:[%s1820_s27 + $0x10] sm:$0xff] %v457_v41  ;;  %v450_v56 = vld [vmem:[%s1820_s27 + $0x58] sm:$0xff]  ;;  %474 = vst [vmem:[%s1820_s27 + $0x18] sm:$0xff] %v458_v45  ;;  %v464_v57 = vadd.f32 %v448_v54, %v383_v27  ;;  %v465_v58 = vadd.f32 %v1795_v21, %v449_v55  ;;  %v451_v60 = vld [vmem:[%s1820_s27 + $0x60] sm:$0xff] }
 0x19e   : > { %475 = vst [vmem:[%s1820_s27 + $0x20] sm:$0xff] %v459_v46  ;;  %476 = vst [vmem:[%s1820_s27 + $0x28] sm:$0xff] %v460_v47  ;;  %v466_v59 = vadd.f32 %v1797_v25, %v450_v56  ;;  %v452_v61 = vld [vmem:[%s1820_s27 + $0x68] sm:$0xff]  ;;  %v453_v62 = vld [vmem:[%s1820_s27 + $0x70] sm:$0xff]  ;;  %v467_v63 = vadd.f32 %v451_v60, %v1801_v31 }
 0x19f   : > { %477 = vst [vmem:[%s1820_s27 + $0x30] sm:$0xff] %v461_v51  ;;  %478 = vst [vmem:[%s1820_s27 + $0x38] sm:$0xff] %v462_v52  ;;  %v468_v0 = vadd.f32 %v452_v61, %v1805_v35  ;;  %v469_v1 = vadd.f32 %v1799_v29, %v453_v62  ;;  %v454_v2 = vld [vmem:[%s1820_s27 + $0x78] sm:$0xff] }
 0x1a0   : > { %479 = vst [vmem:[%s1820_s27 + $0x40] sm:$0xff] %v463_v53  ;;  %480 = vst [vmem:[%s1820_s27 + $0x48] sm:$0xff] %v464_v57  ;;  %v470_v3 = vadd.f32 %v1803_v33, %v454_v2 }
 0x1a1   : > { %481 = vst [vmem:[%s1820_s27 + $0x50] sm:$0xff] %v465_v58  ;;  %482 = vst [vmem:[%s1820_s27 + $0x58] sm:$0xff] %v466_v59 }
 0x1a2   : > { %483 = vst [vmem:[%s1820_s27 + $0x60] sm:$0xff] %v467_v63  ;;  %484 = vst [vmem:[%s1820_s27 + $0x68] sm:$0xff] %v468_v0 }
 0x1a3   : > { %485 = vst [vmem:[%s1820_s27 + $0x70] sm:$0xff] %v469_v1  ;;  %486 = vst [vmem:[%s1820_s27 + $0x78] sm:$0xff] %v470_v3 }
 0x1a4 PF: > { %s2239_s21 = sld [smem:[#allocation19_spill]] }
 0x1aa   : > { %p948_p3 = scmp.ne.s32.totalorder %s2239_s21, 1 }
 0x1ab   : > { %s2240_s3 = sld [smem:[#allocation18_spill]] (!%p948_p3)  ;;  %v1470_v4 = vmov (!%p948_p3), 64  }
 0x1ac   : > { %490 = sbr.rel (%p948_p3) target bundleno = 629 (0x275), region = 48  ;;  %1189 = vset.pattern.permute.xlu1 (!%p948_p3), %v1470_v4  ;;  %1188 = vset.pattern.permute.xlu0 (!%p948_p3), %v1470_v4 }
 0x1b1   : > { %s949_s4 = sshll.u32 (!%p948_p3), %s2240_s3, 7  ;;  %s590_s13 = sadd.s32 (!%p948_p3), 1, %s2240_s3 }
 0x1b2   : > { %s1862_s16 = scalar_lea.vmem (!%p948_p3), [#allocation2], %s949_s4  ;;  %s589_s18 = sld [smem:[#allocation4 + %s2240_s3]] (!%p948_p3) }
 0x1b3   : > { %v1865_v5 = vld [vmem:[%s1862_s16 + $0x10] sm:$0xff]  ;;  %v1868_v6 = vld [vmem:[%s1862_s16] sm:$0xff]  ;;  %v1871_v7 = vld [vmem:[%s1862_s16 + $0x18] sm:$0xff]  ;;  %s591_s25 = sld [smem:[#allocation4 + %s590_s13]]  ;;  %p950_p0 = scmp.ne.s32.totalorder %s2240_s3, 0 }
 0x1b4   : > { %v527_v8 = vmax.f32 %v1865_v5, 1.0  ;;  %v525_v9 = vmax.f32 %v1868_v6, 1.0  ;;  %v1876_v10 = vld [vmem:[%s1862_s16 + $0x8] sm:$0xff]  ;;  %v528_v12 = vmax.f32 %v1871_v7, 1.0  ;;  %v1884_v14 = vld [vmem:[%s1862_s16 + $0x20] sm:$0xff]  ;;  %v1889_v17 = vld [vmem:[%s1862_s16 + $0x38] sm:$0xff] }
 0x1b5   : > { %v1879_v11 = vld [vmem:[%s1862_s16 + $0x28] sm:$0xff]  ;;  %v526_v13 = vmax.f32 %v1876_v10, 1.0  ;;  %v529_v16 = vmax.f32 %v1884_v14, 1.0  ;;  %v1892_v18 = vld [vmem:[%s1862_s16 + $0x30] sm:$0xff]  ;;  %v532_v19 = vmax.f32 %v1889_v17, 1.0  ;;  %v1900_v22 = vld [vmem:[%s1862_s16 + $0x40] sm:$0xff] }
 0x1b6   : > { %1190 = vrcp.f32 %v527_v8  ;;  %v530_v15 = vmax.f32 %v1879_v11, 1.0  ;;  %v531_v20 = vmax.f32 %v1892_v18, 1.0  ;;  %v1897_v21 = vld [vmem:[%s1862_s16 + $0x48] sm:$0xff]  ;;  %vm511_vm0 = vcmp.gt.f32.partialorder %v1865_v5, 0.0  ;;  %v1907_v25 = vld [vmem:[%s1862_s16 + $0x58] sm:$0xff]  ;;  %v1911_v27 = vld [vmem:[%s1862_s16 + $0x50] sm:$0xff] }
 0x1b7   : > { %1192 = vrcp.f32 %v525_v9  ;;  %v534_v23 = vmax.f32 %v1897_v21, 1.0  ;;  %vm509_vm1 = vcmp.gt.f32.partialorder %v1868_v6, 0.0  ;;  %v533_v24 = vmax.f32 %v1900_v22, 1.0  ;;  %v1917_v36 = vld [vmem:[%s1862_s16 + $0x68] sm:$0xff]  ;;  %v1921_v39 = vld [vmem:[%s1862_s16 + $0x60] sm:$0xff]  ;;  %v1927_v44 = vld [vmem:[%s1862_s16 + $0x78] sm:$0xff] }
 0x1b8   : > { %1194 = vrcp.f32 %v528_v12  ;;  %vm512_vm2 = vcmp.gt.f32.partialorder %v1871_v7, 0.0  ;;  %vm510_vm3 = vcmp.gt.f32.partialorder %v1876_v10, 0.0  ;;  %v536_v32 = vmax.f32 %v1907_v25, 1.0  ;;  %v1931_v47 = vld [vmem:[%s1862_s16 + $0x70] sm:$0xff] }
 0x1b9   : > { %1196 = vrcp.f32 %v526_v13  ;;  %v535_v35 = vmax.f32 %v1911_v27, 1.0  ;;  %vm514_vm4 = vcmp.gt.f32.partialorder %v1879_v11, 0.0  ;;  %vm513_vm5 = vcmp.gt.f32.partialorder %v1884_v14, 0.0 }
 0x1ba   : > { %1198 = vrcp.f32 %v530_v15  ;;  %v538_v41 = vmax.f32 %v1917_v36, 1.0  ;;  %v537_v43 = vmax.f32 %v1921_v39, 1.0  ;;  %vm516_vm6 = vcmp.gt.f32.partialorder %v1889_v17, 0.0 }
 0x1bb   : > { %1200 = vrcp.f32 %v529_v16  ;;  %vm515_vm7 = vcmp.gt.f32.partialorder %v1892_v18, 0.0  ;;  %v540_v49 = vmax.f32 %v1927_v44, 1.0  ;;  %v539_v51 = vmax.f32 %v1931_v47, 1.0 }
 0x1bc   : > { %1202 = vrcp.f32 %v532_v19  ;;  %vm518_vm8 = vcmp.gt.f32.partialorder %v1897_v21, 0.0  ;;  %vm517_vm9 = vcmp.gt.f32.partialorder %v1900_v22, 0.0  ;;  %vm520_vm10 = vcmp.gt.f32.partialorder %v1907_v25, 0.0 }
 0x1bd   : > { %1204 = vrcp.f32 %v531_v20  ;;  %vm519_vm11 = vcmp.gt.f32.partialorder %v1911_v27, 0.0  ;;  %vm522_vm12 = vcmp.gt.f32.partialorder %v1917_v36, 0.0  ;;  %vm521_vm13 = vcmp.gt.f32.partialorder %v1921_v39, 0.0 }
 0x1be   : > { %1206 = vrcp.f32 %v534_v23  ;;  %vm524_vm14 = vcmp.gt.f32.partialorder %v1927_v44, 0.0  ;;  %vm523_vm15 = vcmp.gt.f32.partialorder %v1931_v47, 0.0  ;;  %v592_v8 = vlaneseq }
 0x1bf   : > { %1208 = vrcp.f32 %v533_v24  ;;  %v594_v12 = vstv %s589_s18  ;;  %v596_v13 = vstv %s591_s25 }
 0x1c0   : > { %v1191_v26 = vpop.eup %1190  ;;  %1210 = vrcp.f32 %v536_v32  ;;  %v593_v9 = vand.u32 127, %v592_v8 }
 0x1c1   : > { %v1193_v28 = vpop.eup %1192  ;;  %v575_v29 = vsel %vm511_vm0, %v1191_v26, 0.0  ;;  %1212 = vrcp.f32 %v535_v35 }
 0x1c2   : > { %v1195_v30 = vpop.eup %1194  ;;  %611 = vperm.xlu1 %1189, %v575_v29   ;;  %v573_v31 = vsel %vm509_vm1, %v1193_v28, 0.0  ;;  %1214 = vrcp.f32 %v538_v41  ;;  %vm595_vm0 = vcmp.ge.s32.totalorder %v593_v9, %v594_v12  ;;  %vm597_vm1 = vcmp.lt.s32.totalorder %v593_v9, %v596_v13 }
 0x1c3   : > { %v1197_v33 = vpop.eup %1196  ;;  %601 = vperm.xlu0 %1188, %v573_v31   ;;  %v576_v34 = vsel %vm512_vm2, %v1195_v30, 0.0  ;;  %1216 = vrcp.f32 %v537_v43  ;;  %vm1946_vm2 = vmand %vm595_vm0, %vm597_vm1 }
 0x1c4   : > { %v1199_v37 = vpop.eup %1198  ;;  %v574_v38 = vsel %vm510_vm3, %v1197_v33, 0.0  ;;  %1218 = vrcp.f32 %v540_v49 }
 0x1c5   : > { %v1201_v40 = vpop.eup %1200  ;;  %v578_v42 = vsel %vm514_vm4, %v1199_v37, 0.0  ;;  %1220 = vrcp.f32 %v539_v51 }
 0x1c6   : > { %616 = vperm.xlu1 %1189, %v576_v34   ;;  %v1203_v45 = vpop.eup %1202  ;;  %v577_v46 = vsel %vm513_vm5, %v1201_v40, 0.0 }
 0x1c7   : > { %606 = vperm.xlu0 %1188, %v574_v38   ;;  %v1205_v48 = vpop.eup %1204  ;;  %v580_v50 = vsel %vm516_vm6, %v1203_v45, 0.0 }
 0x1c8   : > { %v1207_v52 = vpop.eup %1206  ;;  %v579_v53 = vsel %vm515_vm7, %v1205_v48, 0.0 }
 0x1c9   : > { %v1209_v54 = vpop.eup %1208  ;;  %v582_v55 = vsel %vm518_vm8, %v1207_v52, 0.0 }
 0x1ca   : > { %626 = vperm.xlu1 %1189, %v578_v42   ;;  %v1211_v56 = vpop.eup %1210  ;;  %v581_v57 = vsel %vm517_vm9, %v1209_v54, 0.0 }
 0x1cb   : > { %621 = vperm.xlu0 %1188, %v577_v46   ;;  %v1213_v58 = vpop.eup %1212  ;;  %v584_v59 = vsel %vm520_vm10, %v1211_v56, 0.0 }
 0x1cc   : > { %v1215_v60 = vpop.eup %1214  ;;  %v583_v61 = vsel %vm519_vm11, %v1213_v58, 0.0 }
 0x1cd   : > { %v1217_v62 = vpop.eup %1216  ;;  %v586_v63 = vsel %vm522_vm12, %v1215_v60, 0.0 }
 0x1ce   : > { %636 = vperm.xlu1 %1189, %v580_v50   ;;  %v1219_v0 = vpop.eup %1218  ;;  %v585_v1 = vsel %vm521_vm13, %v1217_v62, 0.0 }
 0x1cf   : > { %631 = vperm.xlu0 %1188, %v579_v53   ;;  %v1221_v2 = vpop.eup %1220  ;;  %v588_v3 = vsel %vm524_vm14, %v1219_v0, 0.0 }
 0x1d0   : > { %v587_v4 = vsel %vm523_vm15, %v1221_v2, 0.0 }
 0x1d2   : > { %646 = vperm.xlu1 %1189, %v582_v55  }
 0x1d3   : > { %641 = vperm.xlu0 %1188, %v581_v57  }
 0x1d6   : > { %656 = vperm.xlu1 %1189, %v584_v59  }
 0x1d7   : > { %651 = vperm.xlu0 %1188, %v583_v61  }
 0x1da   : > { %666 = vperm.xlu1 %1189, %v586_v63  }
 0x1db   : > { %661 = vperm.xlu0 %1188, %v585_v1  }
 0x1de   : > { %676 = vperm.xlu1 %1189, %v588_v3  }
 0x1df   : > { %671 = vperm.xlu0 %1188, %v587_v4  }
 0x241   : > { %v612_v16 = vpop.permute.xlu1 %611 }
 0x242   : > { %v681_v19 = vmul.f32 %v612_v16, %v1865_v5  ;;  %v602_v20 = vpop.permute.xlu0 %601 }
 0x243   : > { %v679_v23 = vmul.f32 %v602_v20, %v1868_v6 }
 0x244   : > { %v1954_v24 = vsel %vm1946_vm2, %v681_v19, 0.0 }
 0x245   : > { %v1958_v26 = vsel %vm1946_vm2, %v679_v23, 0.0  ;;  %v617_v28 = vpop.permute.xlu1 %616  ;;  %717 = vst [vmem:[%s1808_s22 + $0x10] sm:$0xff] (!%p950_p0), %v1954_v24 }
 0x246   : > { %v682_v29 = vmul.f32 %v617_v28, %v1871_v7  ;;  %v607_v30 = vpop.permute.xlu0 %606  ;;  %715 = vst [vmem:[%s1808_s22] sm:$0xff] (!%p950_p0), %v1958_v26 }
 0x247   : > { %v680_v31 = vmul.f32 %v607_v30, %v1876_v10 }
 0x248   : > { %v1964_v5 = vsel %vm1946_vm2, %v682_v29, 0.0 }
 0x249   : > { %v696_v6 = vsel %vm1946_vm2, %v680_v31, 0.0  ;;  %v627_v32 = vpop.permute.xlu1 %626  ;;  %718 = vst [vmem:[%s1808_s22 + $0x18] sm:$0xff] (!%p950_p0), %v1964_v5 }
 0x24a   : > { %v684_v33 = vmul.f32 %v627_v32, %v1879_v11  ;;  %v622_v34 = vpop.permute.xlu0 %621  ;;  %716 = vst [vmem:[%s1808_s22 + $0x8] sm:$0xff] (!%p950_p0), %v696_v6 }
 0x24b   : > { %v683_v35 = vmul.f32 %v622_v34, %v1884_v14 }
 0x24c   : > { %v1972_v37 = vsel %vm1946_vm2, %v684_v33, 0.0 }
 0x24d   : > { %v699_v7 = vsel %vm1946_vm2, %v683_v35, 0.0  ;;  %v637_v10 = vpop.permute.xlu1 %636  ;;  %720 = vst [vmem:[%s1808_s22 + $0x28] sm:$0xff] (!%p950_p0), %v1972_v37 }
 0x24e   : > { %v686_v38 = vmul.f32 %v637_v10, %v1889_v17  ;;  %v632_v40 = vpop.permute.xlu0 %631  ;;  %719 = vst [vmem:[%s1808_s22 + $0x20] sm:$0xff] (!%p950_p0), %v699_v7 }
 0x24f   : > { %v685_v41 = vmul.f32 %v632_v40, %v1892_v18 }
 0x250   : > { %v1980_v42 = vsel %vm1946_vm2, %v686_v38, 0.0 }
 0x251   : > { %v1984_v11 = vsel %vm1946_vm2, %v685_v41, 0.0  ;;  %v647_v14 = vpop.permute.xlu1 %646  ;;  %722 = vst [vmem:[%s1808_s22 + $0x38] sm:$0xff] (!%p950_p0), %v1980_v42 }
 0x252   : > { %v688_v43 = vmul.f32 %v647_v14, %v1897_v21  ;;  %v642_v45 = vpop.permute.xlu0 %641  ;;  %721 = vst [vmem:[%s1808_s22 + $0x30] sm:$0xff] (!%p950_p0), %v1984_v11 }
 0x253   : > { %v687_v46 = vmul.f32 %v642_v45, %v1900_v22 }
 0x254   : > { %v1990_v17 = vsel %vm1946_vm2, %v688_v43, 0.0 }
 0x255   : > { %v703_v18 = vsel %vm1946_vm2, %v687_v46, 0.0  ;;  %v657_v48 = vpop.permute.xlu1 %656  ;;  %724 = vst [vmem:[%s1808_s22 + $0x48] sm:$0xff] (!%p950_p0), %v1990_v17 }
 0x256   : > { %v690_v49 = vmul.f32 %v657_v48, %v1907_v25  ;;  %v652_v50 = vpop.permute.xlu0 %651  ;;  %723 = vst [vmem:[%s1808_s22 + $0x40] sm:$0xff] (!%p950_p0), %v703_v18 }
 0x257   : > { %v689_v51 = vmul.f32 %v652_v50, %v1911_v27 }
 0x258   : > { %v1998_v52 = vsel %vm1946_vm2, %v690_v49, 0.0 }
 0x259   : > { %v705_v21 = vsel %vm1946_vm2, %v689_v51, 0.0  ;;  %v667_v22 = vpop.permute.xlu1 %666  ;;  %726 = vst [vmem:[%s1808_s22 + $0x58] sm:$0xff] (!%p950_p0), %v1998_v52 }
 0x25a   : > { %v692_v53 = vmul.f32 %v667_v22, %v1917_v36  ;;  %v662_v54 = vpop.permute.xlu0 %661  ;;  %725 = vst [vmem:[%s1808_s22 + $0x50] sm:$0xff] (!%p950_p0), %v705_v21 }
 0x25b   : > { %v691_v55 = vmul.f32 %v662_v54, %v1921_v39  ;;  %714 = sbr.rel (%p950_p0) target bundleno = 611 (0x263), region = 52 }
 0x25c   : > { %v2006_v56 = vsel %vm1946_vm2, %v692_v53, 0.0 }
 0x25d   : > { %v2010_v25 = vsel %vm1946_vm2, %v691_v55, 0.0  ;;  %v677_v27 = vpop.permute.xlu1 %676  ;;  %728 = vst [vmem:[%s1808_s22 + $0x68] sm:$0xff] (!%p950_p0), %v2006_v56 }
 0x25e   : > { %v694_v57 = vmul.f32 %v677_v27, %v1927_v44  ;;  %v672_v58 = vpop.permute.xlu0 %671  ;;  %727 = vst [vmem:[%s1808_s22 + $0x60] sm:$0xff] (!%p950_p0), %v2010_v25 }
 0x25f   : > { %v693_v59 = vmul.f32 %v672_v58, %v1931_v47 }
 0x260   : > { %v2016_v36 = vsel %vm1946_vm2, %v694_v57, 0.0 }
 0x261   : > { %v709_v39 = vsel %vm1946_vm2, %v693_v59, 0.0  ;;  %730 = vst [vmem:[%s1808_s22 + $0x78] sm:$0xff] (!%p950_p0), %v2016_v36 }
 0x262   : > { %729 = vst [vmem:[%s1808_s22 + $0x70] sm:$0xff] %v709_v39 }
 0x263 PF: > { %s2243_s1 = sld [smem:[#allocation18_spill]] }
 0x269   : > { %p951_p13 = scmp.le.s32.totalorder %s2243_s1, 0 }
 0x26a   : > { %v735_v44 = vld [vmem:[%s1808_s22] sm:$0xff] (!%p951_p13)  ;;  %v736_v47 = vld [vmem:[%s1808_s22 + $0x8] sm:$0xff] (!%p951_p13)  ;;  %v737_v60 = vld [vmem:[%s1808_s22 + $0x10] sm:$0xff] (!%p951_p13) }
 0x26b   : > { %734 = sbr.rel (%p951_p13) target bundleno = 629 (0x275), region = 56  ;;  %v751_v61 = vadd.f32 (!%p951_p13), %v735_v44, %v1958_v26  ;;  %v752_v62 = vadd.f32 (!%p951_p13), %v736_v47, %v696_v6  ;;  %v753_v63 = vadd.f32 (!%p951_p13), %v737_v60, %v1954_v24  ;;  %v738_v0 = vld [vmem:[%s1808_s22 + $0x18] sm:$0xff] (!%p951_p13)  ;;  %v739_v1 = vld [vmem:[%s1808_s22 + $0x20] sm:$0xff] (!%p951_p13)  ;;  %v740_v2 = vld [vmem:[%s1808_s22 + $0x28] sm:$0xff] (!%p951_p13) }
 0x26c   : > { %v754_v3 = vadd.f32 (!%p951_p13), %v738_v0, %v1964_v5  ;;  %v755_v4 = vadd.f32 (!%p951_p13), %v739_v1, %v699_v7  ;;  %v756_v8 = vadd.f32 (!%p951_p13), %v740_v2, %v1972_v37  ;;  %v741_v9 = vld [vmem:[%s1808_s22 + $0x30] sm:$0xff] (!%p951_p13)  ;;  %v742_v12 = vld [vmem:[%s1808_s22 + $0x38] sm:$0xff] (!%p951_p13)  ;;  %v743_v13 = vld [vmem:[%s1808_s22 + $0x40] sm:$0xff] (!%p951_p13) }
 0x26d   : > { %767 = vst [vmem:[%s1808_s22] sm:$0xff] (!%p951_p13), %v751_v61  ;;  %768 = vst [vmem:[%s1808_s22 + $0x8] sm:$0xff] (!%p951_p13), %v752_v62  ;;  %v757_v15 = vadd.f32 (!%p951_p13), %v741_v9, %v1984_v11  ;;  %v758_v16 = vadd.f32 (!%p951_p13), %v742_v12, %v1980_v42  ;;  %v759_v19 = vadd.f32 (!%p951_p13), %v743_v13, %v703_v18  ;;  %v744_v20 = vld [vmem:[%s1808_s22 + $0x48] sm:$0xff] (!%p951_p13)  ;;  %v745_v23 = vld [vmem:[%s1808_s22 + $0x50] sm:$0xff] (!%p951_p13) }
 0x26e   : > { %769 = vst [vmem:[%s1808_s22 + $0x10] sm:$0xff] (!%p951_p13), %v753_v63  ;;  %v746_v24 = vld [vmem:[%s1808_s22 + $0x58] sm:$0xff] (!%p951_p13)  ;;  %770 = vst [vmem:[%s1808_s22 + $0x18] sm:$0xff] (!%p951_p13), %v754_v3  ;;  %v760_v26 = vadd.f32 (!%p951_p13), %v744_v20, %v1990_v17  ;;  %v761_v28 = vadd.f32 (!%p951_p13), %v745_v23, %v705_v21  ;;  %v747_v30 = vld [vmem:[%s1808_s22 + $0x60] sm:$0xff] (!%p951_p13) }
 0x26f   : > { %771 = vst [vmem:[%s1808_s22 + $0x20] sm:$0xff] (!%p951_p13), %v755_v4  ;;  %772 = vst [vmem:[%s1808_s22 + $0x28] sm:$0xff] (!%p951_p13), %v756_v8  ;;  %v762_v29 = vadd.f32 (!%p951_p13), %v746_v24, %v1998_v52  ;;  %v748_v31 = vld [vmem:[%s1808_s22 + $0x68] sm:$0xff] (!%p951_p13)  ;;  %v749_v5 = vld [vmem:[%s1808_s22 + $0x70] sm:$0xff] (!%p951_p13)  ;;  %v763_v6 = vadd.f32 (!%p951_p13), %v747_v30, %v2010_v25 }
 0x270   : > { %773 = vst [vmem:[%s1808_s22 + $0x30] sm:$0xff] (!%p951_p13), %v757_v15  ;;  %774 = vst [vmem:[%s1808_s22 + $0x38] sm:$0xff] (!%p951_p13), %v758_v16  ;;  %v764_v32 = vadd.f32 (!%p951_p13), %v748_v31, %v2006_v56  ;;  %v765_v33 = vadd.f32 (!%p951_p13), %v749_v5, %v709_v39  ;;  %v750_v34 = vld [vmem:[%s1808_s22 + $0x78] sm:$0xff] (!%p951_p13) }
 0x271   : > { %775 = vst [vmem:[%s1808_s22 + $0x40] sm:$0xff] (!%p951_p13), %v759_v19  ;;  %776 = vst [vmem:[%s1808_s22 + $0x48] sm:$0xff] (!%p951_p13), %v760_v26  ;;  %v766_v35 = vadd.f32 (!%p951_p13), %v750_v34, %v2016_v36 }
 0x272   : > { %777 = vst [vmem:[%s1808_s22 + $0x50] sm:$0xff] %v761_v28  ;;  %778 = vst [vmem:[%s1808_s22 + $0x58] sm:$0xff] %v762_v29 }
 0x273   : > { %779 = vst [vmem:[%s1808_s22 + $0x60] sm:$0xff] %v763_v6  ;;  %780 = vst [vmem:[%s1808_s22 + $0x68] sm:$0xff] %v764_v32 }
 0x274   : > { %781 = vst [vmem:[%s1808_s22 + $0x70] sm:$0xff] %v765_v33  ;;  %782 = vst [vmem:[%s1808_s22 + $0x78] sm:$0xff] %v766_v35 }
 0x275 PF: > { %s2244_s12 = sld [smem:[#allocation20_spill]]  ;;  %s2246_s27 = sld [smem:[#allocation26_spill]] }
 0x276   : > { %s797_s4 = sshll.u32 %s1808_s22, 4  ;;  %s2103_s16 = scalar_lea.sflag [#allocation7], %s231_s14  ;;  %s2099_s4 = int_to_ptr.vmem [resolvable:$true] %s797_s4 }
 0x277   : > { %s1292_s13 = scalar_lea.vmem %s2099_s4, 2048  ;;  %p2248_p10 = scmp.ne.s32.totalorder %s2226_s17, 0 }
 0x278   : > { %p1293_p8 = scmp.ne.s32.totalorder %s2099_s4, %s1292_s13  ;;  %s1471_s18 = smov [#allocation10]  }
 0x279   : > { %s1296_s25 = sshll.u32 %s1471_s18, 4  ;;  %s1297_s25 = int_to_ptr.vmem [resolvable:$false] %s1296_s25 }
 0x27a   : > { %p1294_p1 = pnand %p1293_p8, %p2248_p10  ;;  %s1298_s1 = scalar_lea.vmem %s1297_s25, 4096 }
 0x27b   : > { %s959_s11 = sshll.u32 %s2244_s12, 11  ;;  %s2247_s21 = smov %s2246_s27 }
 0x27c   : > { %s2096_s3 = scalar_lea.hbm %s2246_s27, %s959_s11  ;;  %p1295_p2 = pneg %p1294_p1 }
 0x27d   : > { %p1299_p4 = scmp.lt.s32.totalorder %s2099_s4, %s1297_s25  ;;  %p1300_p12 = scmp.lt.s32.totalorder %s1298_s1, %s1292_s13 }
 0x27f   : > { %p1301_p11 = por %p1300_p12, %p1299_p4 }
 0x281   : > { %p1302_p6 = pnand %p1301_p11, %p1295_p2 }
 0x283   : > { %1305 = shalt.err (!%p1302_p6)
}
 0x284   : > { %s1306_s14 = scalar_lea.hbm %s2096_s3, 2048  ;;  %s1310_s20 = scalar_lea.hbm %s2247_s21, 4096 }
 0x285   : > { %p1307_p7 = scmp.ne.s32.totalorder %s2096_s3, %s1306_s14  ;;  %p1311_p3 = scmp.lt.u32.totalorder %s2096_s3, %s2247_s21 }
 0x286   : > { %p1312_p0 = scmp.lt.u32.totalorder %s1310_s20, %s1306_s14  ;;  %p1314_p8 = scmp.lt.u32.totalorder %s1306_s14, %s2096_s3 }
 0x287   : > { %p1308_p9 = pnand %p1307_p7, %p2248_p10 }
 0x288   : > { %p1313_p13 = por %p1312_p0, %p1311_p3 }
 0x289   : > { %p1309_p5 = pneg %p1308_p9 }
 0x28a   : > { %p1315_p1 = por %p1314_p8, %p1313_p13 }
 0x28c   : > { %p1316_p2 = pnand %p1315_p1, %p1309_p5 }
 0x28e   : > { %1319 = shalt.err (!%p1316_p2)
}
 0x28f   : > { %s1472_s23 = smov 128   ;;  %s1473_s27 = smov 8  }
 0x290   : > { %1028 = dma.vmem_to_hbm [thread:$0]  (%p2248_p10), %s2099_s4, 2048, %s2096_s3, %s2103_s16, %s1472_s23, %s1472_s23, %s1473_s27  }
 0x291 PF: > { %s2249_s13 = sld [smem:[#allocation15_spill]]  ;;  %p1042_p4 = scmp.ge.s32.totalorder %s1460_s9, 2 }
 0x292   : > { %p2250_p12 = scmp.ne.s32.totalorder %s2227_s2, 0 }
 0x294   : > { %p1038_p11 = pnand %p1042_p4, %p2250_p12 }
 0x297   : > { %s812_s18 = sand.u32 1, %s2249_s13  }
 0x298   : > { %s813_s25 = scalar_lea.sflag [#allocation7], %s812_s18 }
 0x299   : > { %1395 = dma.done.wait (!%p1038_p11), %s813_s25, 2048  }
 0x29a   : > { %1397 = vsyncadd (!%p1038_p11), %s813_s25, 4294965248  ;;  %s26_s9 = sadd.s32 1, %s1460_s9   ;;  %s2252_s22 = sld [smem:[#allocation16_spill]] }
 0x29b   : > { %p2132_p6 = scmp.ge.s32.totalorder %s26_s9, 14   ;;  %s2253_s17 = sld [smem:[#allocation21_spill]] }
 0x29c   : > { %s2254_s2 = sld [smem:[#allocation22_spill]]  ;;  %s2255_s3 = sld [smem:[#allocation23_spill]] }
 0x29d   : > { %s2256_s23 = smov %s1408_s24  ;;  %s2257_s24 = smov %s1625_s5 }
 0x29e   : > { %s2258_s25 = smov %s1416_s26  ;;  %s2259_s26 = smov %s1420_s0 }
 0x29f   : > { %s2260_s0 = smov %s1688_s19  ;;  %s2261_s27 = smov %s1428_s28 }
 0x2a0   : > { %s2262_s28 = smov %s1432_s29  ;;  %s2263_s29 = smov %s1628_s30 }
 0x2a1   : > { %s2264_s30 = smov %s1448_s6  ;;  %s2265_s4 = smov %s1452_s7 }
 0x2a2   : > { %s2266_s5 = smov %s1456_s8  ;;  %s2267_s6 = smov %s2253_s17 }
 0x2a3   : > { %s2268_s7 = smov %s2254_s2  ;;  %s2269_s8 = smov %s2255_s3 }
 0x2a4   :  { %25 = sbr.rel (!%p2132_p6) target bundleno = 26 (0x1a), region = 109 }
 0x2ab   :  { %818 = vsyncpa [#allocation6], 1 }
 0x2ac   :  { %820 = vsyncpa [#allocation6 + $0x1], 1 }
 0x2ad   :  { %821 = vsyncpa [#allocation9], 1 }
 0x2ae   :  { %823 = vsyncpa [#allocation9 + $0x1], 1 }
 0x2af   :  { %824 = vsyncpa [#allocation7], 1 }
 0x2b0   :  { %826 = vsyncpa [#allocation7 + $0x1], 1 }

</bundles_post_ra>
